<compile_context>
chip_gen: v7x
topology: tpu7x:2x2x1
jax: 0.10.0
libtpu: 0.0.40
codegen_flags: <defaults>
</compile_context>

<pallas_src>
import functools

import jax
import jax.numpy as jnp
from jax.experimental import pallas as pl
from jax.experimental.pallas import tpu as pltpu

LANE = 128


def _round_up(v, m):
    return (v + m - 1) // m * m


def mixnet_fused_kernel(patches_ref, cw_ref, cb_ref, fw_ref, fb_ref, out_ref,
                        *, inv_hw):
    """Fused backbone (im2col conv matmul + ReLU + GAP) + min + fc for one image.

    Grid: (B,)  — batch axis "parallel"; one image per step, no reduction axis.

      patches_ref: (1, HW, K_PAD)   f32  lane-dense im2col patches (zero-padded K)
      cw_ref     : (K_PAD, F_PAD)   f32  conv weight (row = (kh*3+kw)*C + c, padded)
      cb_ref     : (1, F_PAD)       f32  conv bias   (zero-padded to 128 lanes)
      fw_ref     : (F_PAD, NC_PAD)  f32  fc weight   (zero-padded)
      fb_ref     : (1, NC_PAD)      f32  fc bias     (zero-padded)
      out_ref    : (1, 1, NC_PAD)   f32  logits (lane-dense; sliced outside)
    """
    patches = patches_ref[0]                                # (HW, K_PAD)

    # 3x3 conv == one MXU matmul over the im2col patches (zero-padded K rows of
    # cw_ref contribute nothing).  f32 in, f32 accumulate.
    conv = jnp.dot(patches, cw_ref[...],
                   preferred_element_type=jnp.float32)      # (HW, F_PAD)
    conv = jnp.maximum(conv + cb_ref[...], 0.0)             # bias + ReLU

    # Global average pool: sublane-only reduce over the (HW, F_PAD) tile.
    feat1 = jnp.sum(conv, axis=0, keepdims=True) * inv_hw   # (1, F_PAD)

    # Reference calls net1(x) twice; both features are identical, so the backbone
    # is computed once and reused.  torch.min(f1, f1) == f1 (min kept for clarity).
    feat = jnp.minimum(feat1, feat1)

    # fc head, kept in f32 (shape is tiny; avoids bf16 rounding vs. reference).
    logits = jnp.dot(feat, fw_ref[...],
                     preferred_element_type=jnp.float32) + fb_ref[...]
    out_ref[...] = logits[None]                             # (1, 1, NC_PAD)


def mixnet_forward(x, params):
    """MixNet.forward: f1 = net1(x); f2 = net1(x); f = min(f1, f2); fc(f)."""
    conv_w, conv_b, fc_w, fc_b = params                     # torch-like shapes
    B, C, H, W = x.shape
    hidden = conv_w.shape[-1]
    num_classes = fc_w.shape[-1]
    HW = H * W
    k = 9 * C

    k_pad = _round_up(k, LANE)
    f_pad = _round_up(hidden, LANE)
    nc_pad = _round_up(num_classes, LANE)

    # XLA-side im2col (tiny at these sizes: B*HW*K_PAD*4 bytes = 256 KiB total).
    # Gives the kernel a fully lane-dense, contiguous patch layout: no C=4
    # lane-sparse loads, no per-channel cross-lane broadcasts, no shifted-slice
    # re-layout copies inside the kernel.
    xp = jnp.pad(x.astype(jnp.float32), ((0, 0), (0, 0), (1, 1), (1, 1)))
    taps = [xp[:, :, i:i + H, j:j + W] for i in range(3) for j in range(3)]
    patches = jnp.stack(taps, axis=1).reshape(B, k, HW)     # (B, 9*C, H*W)
    patches = jnp.transpose(patches, (0, 2, 1))             # (B, H*W, 9*C)
    patches = jnp.pad(patches, ((0, 0), (0, 0), (0, k_pad - k)))

    # Zero-pad weights so every kernel tile is 128-lane dense.
    cw = conv_w.reshape(k, hidden).astype(jnp.float32)      # row = (kh*3+kw)*C + c
    cw = jnp.pad(cw, ((0, k_pad - k), (0, f_pad - hidden)))
    cb = jnp.pad(conv_b.reshape(1, hidden).astype(jnp.float32),
                 ((0, 0), (0, f_pad - hidden)))
    fw = jnp.pad(fc_w.astype(jnp.float32),
                 ((0, f_pad - hidden), (0, nc_pad - num_classes)))
    fb = jnp.pad(fc_b.reshape(1, num_classes).astype(jnp.float32),
                 ((0, 0), (0, nc_pad - num_classes)))

    kernel = functools.partial(mixnet_fused_kernel, inv_hw=1.0 / float(HW))

    logits_padded = pl.pallas_call(
        kernel,
        out_shape=jax.ShapeDtypeStruct((B, 1, nc_pad), jnp.float32),
        grid_spec=pltpu.PrefetchScalarGridSpec(
            num_scalar_prefetch=0,
            grid=(B,),
            in_specs=[
                pl.BlockSpec((1, HW, k_pad), lambda b: (b, 0, 0)),
                pl.BlockSpec((k_pad, f_pad), lambda b: (0, 0)),
                pl.BlockSpec((1, f_pad), lambda b: (0, 0)),
                pl.BlockSpec((f_pad, nc_pad), lambda b: (0, 0)),
                pl.BlockSpec((1, nc_pad), lambda b: (0, 0)),
            ],
            out_specs=pl.BlockSpec((1, 1, nc_pad), lambda b: (b, 0, 0)),
        ),
        compiler_params=pltpu.CompilerParams(
            dimension_semantics=("parallel",),
        ),
    )(patches, cw, cb, fw, fb)

    return logits_padded[:, 0, :num_classes]


def mixnet_reference(x, params):
    """Pure-JAX reference of the same forward pass (f32 end-to-end)."""
    conv_w, conv_b, fc_w, fc_b = params
    B, C, H, W = x.shape
    xp = jnp.pad(x, ((0, 0), (0, 0), (1, 1), (1, 1)))
    conv = jnp.zeros((B, H, W, conv_w.shape[-1]), jnp.float32)
    for i in range(3):
        for j in range(3):
            conv = conv + jnp.einsum('bchw,co->bhwo',
                                     xp[:, :, i:i + H, j:j + W], conv_w[i, j])
    conv = jnp.maximum(conv + conv_b, 0.0)
    feat1 = conv.mean(axis=(1, 2))
    feat2 = feat1                         # net1(x) called twice in the reference
    feat = jnp.minimum(feat1, feat2)
    return feat @ fc_w + fc_b


if __name__ == "__main__":
    B, C, H, W = 2, 4, 16, 16
    HIDDEN = 32
    NUM_CLASSES = 10

    key = jax.random.PRNGKey(0)
    k_x, k_cw, k_cb, k_fw, k_fb = jax.random.split(key, 5)

    x = jax.random.normal(k_x, (B, C, H, W), dtype=jnp.float32)

    # Synthetic backbone params. conv_w layout (kh, kw, C, O) corresponds to
    # torch conv weight (O, C, kh, kw).transpose(2, 3, 1, 0).
    conv_w = jax.random.normal(k_cw, (3, 3, C, HIDDEN), dtype=jnp.float32) * 0.1
    conv_b = jax.random.normal(k_cb, (HIDDEN,), dtype=jnp.float32) * 0.1
    fc_w = jax.random.normal(k_fw, (HIDDEN, NUM_CLASSES), dtype=jnp.float32) * 0.1
    fc_b = jax.random.normal(k_fb, (NUM_CLASSES,), dtype=jnp.float32) * 0.1
    params = (conv_w, conv_b, fc_w, fc_b)

    logits = jax.jit(mixnet_forward)(x, params)
    jax.block_until_ready(logits)

    ref = mixnet_reference(x, params)
    assert logits.shape == (B, NUM_CLASSES)
    assert bool(jnp.all(jnp.isfinite(logits)))
    assert bool(jnp.allclose(logits, ref, atol=2e-2, rtol=2e-2)), \
        float(jnp.max(jnp.abs(logits - ref)))
    print("KERNEL_OK")
</pallas_src>

<mosaic_0001>
module attributes {stable_mosaic.version = 11 : i64} {
  func.func @mixnet_fused_kernel(%arg0: i32, %arg1: memref<1x256x128xf32, #tpu.memory_space<vmem>>, %arg2: memref<128x128xf32, #tpu.memory_space<vmem>>, %arg3: memref<1x128xf32, #tpu.memory_space<vmem>>, %arg4: memref<128x128xf32, #tpu.memory_space<vmem>>, %arg5: memref<1x128xf32, #tpu.memory_space<vmem>>, %arg6: memref<1x1x128xf32, #tpu.memory_space<vmem>>) attributes {dimension_semantics = [#tpu.dimension_semantics<parallel>], iteration_bounds = array<i64: 2>, scalar_prefetch = 0 : i64, scratch_operands = 0 : i64, tpu.core_type = #tpu.core_type<tc>, window_params = [{transform_indices = @transform_0, window_bounds = array<i64: 1, 256, 128>}, {pipeline_mode = #tpu.pipeline_mode<synchronous>, transform_indices = @transform_1, window_bounds = array<i64: 128, 128>}, {pipeline_mode = #tpu.pipeline_mode<synchronous>, transform_indices = @transform_2, window_bounds = array<i64: 1, 128>}, {pipeline_mode = #tpu.pipeline_mode<synchronous>, transform_indices = @transform_3, window_bounds = array<i64: 128, 128>}, {pipeline_mode = #tpu.pipeline_mode<synchronous>, transform_indices = @transform_4, window_bounds = array<i64: 1, 128>}, {transform_indices = @transform_5, window_bounds = array<i64: 1, 1, 128>}]} {
    %c0 = arith.constant 0 : index
    %c0_0 = arith.constant 0 : index
    %c0_1 = arith.constant 0 : index
    %0 = vector.load %arg1[%c0, %c0_0, %c0_1] : memref<1x256x128xf32, #tpu.memory_space<vmem>>, vector<1x256x128xf32>
    %1 = vector.shape_cast %0 : vector<1x256x128xf32> to vector<256x128xf32>
    %c0_2 = arith.constant 0 : index
    %c0_3 = arith.constant 0 : index
    %2 = vector.load %arg2[%c0_2, %c0_3] : memref<128x128xf32, #tpu.memory_space<vmem>>, vector<128x128xf32>
    %cst = arith.constant dense<0.000000e+00> : vector<256x128xf32>
    %3 = tpu.matmul %1, %2, %cst {dimension_numbers = #tpu.dot_dimension_numbers<[1], [0], [0], [1], [0, 0, 1, 1], [], []>} : vector<256x128xf32>, vector<128x128xf32>, vector<256x128xf32> -> vector<256x128xf32>
    %c0_4 = arith.constant 0 : index
    %c0_5 = arith.constant 0 : index
    %4 = vector.load %arg3[%c0_4, %c0_5] : memref<1x128xf32, #tpu.memory_space<vmem>>, vector<1x128xf32>
    %5 = vector.broadcast %4 : vector<1x128xf32> to vector<256x128xf32>
    %6 = arith.addf %3, %5 : vector<256x128xf32>
    %cst_6 = arith.constant 0.000000e+00 : f32
    %7 = vector.broadcast %cst_6 : f32 to vector<256x128xf32>
    %8 = arith.maximumf %6, %7 : vector<256x128xf32>
    %cst_7 = arith.constant dense<0.000000e+00> : vector<128xf32>
    %9 = vector.multi_reduction <add>, %8, %cst_7 [0] : vector<256x128xf32> to vector<128xf32>
    %10 = vector.shape_cast %9 : vector<128xf32> to vector<1x128xf32>
    %cst_8 = arith.constant 3.906250e-03 : f32
    %11 = vector.broadcast %cst_8 : f32 to vector<1x128xf32>
    %12 = arith.mulf %10, %11 : vector<1x128xf32>
    %13 = arith.minimumf %12, %12 : vector<1x128xf32>
    %c0_9 = arith.constant 0 : index
    %c0_10 = arith.constant 0 : index
    %14 = vector.load %arg4[%c0_9, %c0_10] : memref<128x128xf32, #tpu.memory_space<vmem>>, vector<128x128xf32>
    %cst_11 = arith.constant dense<0.000000e+00> : vector<1x128xf32>
    %15 = tpu.matmul %13, %14, %cst_11 {dimension_numbers = #tpu.dot_dimension_numbers<[1], [0], [0], [1], [0, 0, 1, 1], [], []>} : vector<1x128xf32>, vector<128x128xf32>, vector<1x128xf32> -> vector<1x128xf32>
    %c0_12 = arith.constant 0 : index
    %c0_13 = arith.constant 0 : index
    %16 = vector.load %arg5[%c0_12, %c0_13] : memref<1x128xf32, #tpu.memory_space<vmem>>, vector<1x128xf32>
    %17 = arith.addf %15, %16 : vector<1x128xf32>
    %18 = vector.shape_cast %17 : vector<1x128xf32> to vector<1x1x128xf32>
    %c0_14 = arith.constant 0 : index
    %c0_15 = arith.constant 0 : index
    %c0_16 = arith.constant 0 : index
    %19 = vector.load %arg6[%c0_14, %c0_15, %c0_16] : memref<1x1x128xf32, #tpu.memory_space<vmem>>, vector<1x1x128xf32>
    tpu.vector_store %arg6[%c0_14, %c0_15, %c0_16], %18 {strides = array<i32>} : memref<1x1x128xf32, #tpu.memory_space<vmem>>, vector<1x1x128xf32>,
    return
  }
  func.func @transform_0(%arg0: i32) -> (i32, i32, i32) {
    %c0_i32 = arith.constant 0 : i32
    %c0_i32_0 = arith.constant 0 : i32
    %c0_i32_1 = arith.constant 0 : i32
    return %arg0, %c0_i32, %c0_i32_0 : i32, i32, i32
  }
  func.func @transform_1(%arg0: i32) -> (i32, i32) {
    %c0_i32 = arith.constant 0 : i32
    %c0_i32_0 = arith.constant 0 : i32
    %c0_i32_1 = arith.constant 0 : i32
    return %c0_i32, %c0_i32_0 : i32, i32
  }
  func.func @transform_2(%arg0: i32) -> (i32, i32) {
    %c0_i32 = arith.constant 0 : i32
    %c0_i32_0 = arith.constant 0 : i32
    %c0_i32_1 = arith.constant 0 : i32
    return %c0_i32, %c0_i32_0 : i32, i32
  }
  func.func @transform_3(%arg0: i32) -> (i32, i32) {
    %c0_i32 = arith.constant 0 : i32
    %c0_i32_0 = arith.constant 0 : i32
    %c0_i32_1 = arith.constant 0 : i32
    return %c0_i32, %c0_i32_0 : i32, i32
  }
  func.func @transform_4(%arg0: i32) -> (i32, i32) {
    %c0_i32 = arith.constant 0 : i32
    %c0_i32_0 = arith.constant 0 : i32
    %c0_i32_1 = arith.constant 0 : i32
    return %c0_i32, %c0_i32_0 : i32, i32
  }
  func.func @transform_5(%arg0: i32) -> (i32, i32, i32) {
    %c0_i32 = arith.constant 0 : i32
    %c0_i32_0 = arith.constant 0 : i32
    %c0_i32_1 = arith.constant 0 : i32
    return %arg0, %c0_i32, %c0_i32_0 : i32, i32, i32
  }
}

</mosaic_0001>

<bundles_post_ra>
// kernel: mixnet_forward.1
= control target key start
LH: loop header
LB: loop body
LE: loop exit
PB: predicated region body
PF: predicated region fallthrough
CT: control target
= control target key end

     0   :  { %10 = vsyncpa [#allocation3], 0  ;;  %s1385_s0 = inlined_call_operand.vmem [shape: f32[2,256,128], index: 0, kind: input, shape index: {}]   ;;  %s1386_s1 = inlined_call_operand.vmem [shape: f32[128,128], index: 1, kind: input, shape index: {}]   ;;  %s1387_s2 = inlined_call_operand.vmem [shape: f32[1,128], index: 2, kind: input, shape index: {}]   ;;  %s1388_s3 = inlined_call_operand.vmem [shape: f32[128,128], index: 3, kind: input, shape index: {}]   ;;  %s1389_s4 = inlined_call_operand.vmem [shape: f32[1,128], index: 4, kind: input, shape index: {}]   ;;  %s1390_s5 = inlined_call_operand.hbm [shape: f32[2,1,128], index: 5, kind: output, shape index: {}]  }
   0x1   :  { %12 = vsyncpa [#allocation3 + $0x1], 0  ;;  %s1115_s18 = smov 0   ;;  %s1117_s19 = smov 0  }
   0x2   :  { %s1119_s20 = smov 0   ;;  %s1121_s21 = smov 0  }
   0x3 LB: > { %s1136_s22 = sadd.s32 4294967295, %s1079_s21   ;;  %s728_s23 = sadd.s32 4294967294, %s1079_s21   ;;  %s1079_s21 = sphi %s1121_s21, %s1396_s21   ;;  %s1075_s20 = sphi %s1119_s20, %s1395_s20   ;;  %s1071_s19 = sphi %s1117_s19, %s1394_s19   ;;  %s1067_s18 = sphi %s1115_s18, %s1393_s18  }
   0x4   : > { %s1140_s24 = sadd.s32 1, %s1079_s21   ;;  %s135_s25 = sadd.s32 1, %s1075_s20 }
   0x5   : > { %s132_s26 = ssub.s32 %s1079_s21, %s1140_s24  ;;  %p145_p0 = scmp.ne.s32.totalorder %s1075_s20, %s1071_s19 }
   0x6   : > { %p133_p1 = scmp.eq.s32.totalorder %s132_s26, 0  ;;  %p146_p2 = scmp.eq.s32.totalorder %s1136_s22, 1 }
   0x7   : > { %p151_p3 = scmp.ne.s32.totalorder %s1071_s19, %s1067_s18  ;;  %p152_p4 = scmp.eq.s32.totalorder %s728_s23, 1 }
   0x8   : > { %s1151_s27 = scalar_select %p133_p1, %s1075_s20, %s135_s25  }
   0x9   : > { %p1153_p5 = por %p146_p2, %p145_p0  ;;  %p1157_p6 = por %p152_p4, %p151_p3 }
   0xa   : > { %p731_p7 = scmp.ge.s32.totalorder %s1079_s21, 1  ;;  %p190_p8 = scmp.lt.s32.totalorder %s1079_s21, 3 }
   0xc   : > { %p191_p9 = pnand %p731_p7, %p190_p8 }
   0xd   : > { %v254_v0 = vld [vmem:[%s1386_s1] sm:$0xff] (!%p191_p9)  ;;  %v255_v1 = vld [vmem:[%s1386_s1 + $0x8] sm:$0xff] (!%p191_p9)  ;;  %v256_v2 = vld [vmem:[%s1386_s1 + $0x10] sm:$0xff] (!%p191_p9)  ;;  %p217_p10 = scmp.lt.s32.totalorder (!%p191_p9), %s1136_s22, 1  ;;  %v1081_v59 = vmov (!%p191_p9), 0.0|0.0   ;;  %vm1082_vm0 = vmmov (!%p191_p9), 0  }
   0xe   : > { %194 = sbr.rel (%p191_p9) target bundleno = 571 (0x23b), region = 40  ;;  %v919_v3 = vpack.c.bf16 (!%p191_p9), %v255_v1, %v254_v0  ;;  %v257_v4 = vld [vmem:[%s1386_s1 + $0x18] sm:$0xff] (!%p191_p9)  ;;  %v258_v6 = vld [vmem:[%s1386_s1 + $0x20] sm:$0xff] (!%p191_p9)  ;;  %v259_v7 = vld [vmem:[%s1386_s1 + $0x28] sm:$0xff] (!%p191_p9)  ;;  %951 = vmatprep.subr.bf16.mxu1 (!%p191_p9), %v1081_v59  ;;  %s215_s13 = sand.u32 (!%p191_p9), 1, %s1071_s19  }
   0xf   : > { %v923_v5 = vpack.c.bf16 (!%p191_p9), %v257_v4, %v256_v2  ;;  %v927_v8 = vpack.c.bf16 (!%p191_p9), %v259_v7, %v258_v6  ;;  %v260_v9 = vld [vmem:[%s1386_s1 + $0x30] sm:$0xff] (!%p191_p9)  ;;  %v261_v10 = vld [vmem:[%s1386_s1 + $0x38] sm:$0xff] (!%p191_p9)  ;;  %v262_v13 = vld [vmem:[%s1386_s1 + $0x40] sm:$0xff] (!%p191_p9)  ;;  %s735_s16 = sshll.u32 (!%p191_p9), %s1136_s22, 4  ;;  %s661_s6 = scalar_lea.sflag (!%p191_p9), [#allocation3], %s215_s13 }
  0x10   : > { %920 = vmatprep.subr.bf16.mxu0 (!%p191_p9), %v919_v3  ;;  %v931_v12 = vpack.c.bf16 (!%p191_p9), %v261_v10, %v260_v9  ;;  %v263_v14 = vld [vmem:[%s1386_s1 + $0x48] sm:$0xff] (!%p191_p9)  ;;  %v264_v16 = vld [vmem:[%s1386_s1 + $0x50] sm:$0xff] (!%p191_p9)  ;;  %v265_v17 = vld [vmem:[%s1386_s1 + $0x58] sm:$0xff] (!%p191_p9)  ;;  %s1343_s26 = scalar_lea.hbm (!%p191_p9), %s1390_s5, %s735_s16 }
  0x11   : > { %922 = vmatpush3.bf16.msra.mxu0 (!%p191_p9), %v919_v3  ;;  %v935_v15 = vpack.c.bf16 (!%p191_p9), %v263_v14, %v262_v13  ;;  %v939_v18 = vpack.c.bf16 (!%p191_p9), %v265_v17, %v264_v16  ;;  %v266_v19 = vld [vmem:[%s1386_s1 + $0x60] sm:$0xff] (!%p191_p9)  ;;  %v267_v20 = vld [vmem:[%s1386_s1 + $0x68] sm:$0xff] (!%p191_p9)  ;;  %v268_v22 = vld [vmem:[%s1386_s1 + $0x70] sm:$0xff] (!%p191_p9)  ;;  %v1083_v14 = vmov (!%p191_p9), 0.0  }
  0x12   : > { %924 = vmatprep.subr.bf16.mxu0 (!%p191_p9), %v923_v5  ;;  %v943_v21 = vpack.c.bf16 (!%p191_p9), %v267_v20, %v266_v19  ;;  %v269_v23 = vld [vmem:[%s1386_s1 + $0x78] sm:$0xff] (!%p191_p9)  ;;  %v572_v56 = vld [vmem:[%s1388_s3] sm:$0xff] (!%p191_p9)  ;;  %v573_v57 = vld [vmem:[%s1388_s3 + $0x8] sm:$0xff] (!%p191_p9)  ;;  %916 = vmatprep.mubr.msk.f32.mxu1 (!%p191_p9), %vm1082_vm0, %v1083_v14 }
  0x13   : > { %v947_v24 = vpack.c.bf16 (!%p191_p9), %v269_v23, %v268_v22  ;;  %v952_v58 = vpack.c.bf16 (!%p191_p9), %v573_v57, %v572_v56  ;;  %v574_v60 = vld [vmem:[%s1388_s3 + $0x10] sm:$0xff] (!%p191_p9)  ;;  %v575_v61 = vld [vmem:[%s1388_s3 + $0x18] sm:$0xff] (!%p191_p9)  ;;  %v576_v63 = vld [vmem:[%s1388_s3 + $0x20] sm:$0xff] (!%p191_p9) }
  0x14   : > { %v955_v62 = vpack.c.bf16 (!%p191_p9), %v575_v61, %v574_v60  ;;  %v577_v0 = vld [vmem:[%s1388_s3 + $0x28] sm:$0xff] (!%p191_p9)  ;;  %v578_v2 = vld [vmem:[%s1388_s3 + $0x30] sm:$0xff] (!%p191_p9)  ;;  %v579_v3 = vld [vmem:[%s1388_s3 + $0x38] sm:$0xff] (!%p191_p9) }
  0x15   : > { %s218_s17 = scalar_select %p217_p10, %s1136_s22, 1  ;;  %926 = vmatpush3.bf16.msra.mxu0 %v923_v5  ;;  %953 = vmatpush3.bf16.msra.mxu1 %v952_v58  ;;  %v958_v1 = vpack.c.bf16 %v577_v0, %v576_v63  ;;  %v961_v4 = vpack.c.bf16 %v579_v3, %v578_v2  ;;  %v580_v5 = vld [vmem:[%s1388_s3 + $0x40] sm:$0xff]  ;;  %v581_v6 = vld [vmem:[%s1388_s3 + $0x48] sm:$0xff]  ;;  %v583_v9 = vld [vmem:[%s1388_s3 + $0x58] sm:$0xff] }
  0x16   : > { %928 = vmatprep.subr.bf16.mxu0 %v927_v8  ;;  %954 = vmatprep.subr.bf16.mxu1 %v1081_v59  ;;  %v964_v7 = vpack.c.bf16 %v581_v6, %v580_v5  ;;  %v587_v16 = vld [vmem:[%s1388_s3 + $0x78] sm:$0xff]  ;;  %s1084_s22 = smov [#allocation2]  }
  0x17   : > { %s738_s23 = sshll.u32 %s218_s17, 8  ;;  %s216_s17 = scalar_lea.vmem [#allocation2], %s215_s13 }
  0x18   : > { %s1186_s30 = scalar_lea.vmem %s1385_s0, %s738_s23  ;;  %s1021_s8 = sshll.u32 %s1084_s22, 4  ;;  %s1022_s8 = int_to_ptr.vmem [resolvable:$false] %s1021_s8 }
  0x19   : > { %v222_v11 = vld [vmem:[%s1186_s30] sm:$0xff]  ;;  %930 = vmatpush3.bf16.msra.mxu0 %v927_v8  ;;  %v223_v25 = vld [vmem:[%s1186_s30 + $0x8] sm:$0xff]  ;;  %v224_v26 = vld [vmem:[%s1186_s30 + $0x10] sm:$0xff]  ;;  %956 = vmatpush3.bf16.msra.mxu1 %v955_v62  ;;  %s1023_s9 = scalar_lea.vmem %s1022_s8, 32 }
  0x1a   : > { %836 = vmatprep.mubr.f32.mxu0 %v222_v11  ;;  %932 = vmatprep.subr.bf16.mxu0 %v931_v12  ;;  %v225_v27 = vld [vmem:[%s1186_s30 + $0x18] sm:$0xff]  ;;  %v226_v28 = vld [vmem:[%s1186_s30 + $0x20] sm:$0xff]  ;;  %v227_v29 = vld [vmem:[%s1186_s30 + $0x28] sm:$0xff] }
  0x1b   : > { %v228_v30 = vld [vmem:[%s1186_s30 + $0x30] sm:$0xff]  ;;  %v229_v31 = vld [vmem:[%s1186_s30 + $0x38] sm:$0xff]  ;;  %v230_v32 = vld [vmem:[%s1186_s30 + $0x40] sm:$0xff]  ;;  %957 = vmatprep.subr.bf16.mxu1 %v1081_v59 }
  0x1c   : > { %v231_v33 = vld [vmem:[%s1186_s30 + $0x48] sm:$0xff]  ;;  %v232_v34 = vld [vmem:[%s1186_s30 + $0x50] sm:$0xff]  ;;  %v233_v35 = vld [vmem:[%s1186_s30 + $0x58] sm:$0xff] }
  0x1d   : > { %934 = vmatpush3.bf16.msra.mxu0 %v931_v12  ;;  %v234_v36 = vld [vmem:[%s1186_s30 + $0x60] sm:$0xff]  ;;  %v235_v37 = vld [vmem:[%s1186_s30 + $0x68] sm:$0xff]  ;;  %v236_v38 = vld [vmem:[%s1186_s30 + $0x70] sm:$0xff]  ;;  %959 = vmatpush3.bf16.msra.mxu1 %v958_v1 }
  0x1e   : > { %936 = vmatprep.subr.bf16.mxu0 %v935_v15  ;;  %v237_v39 = vld [vmem:[%s1186_s30 + $0x78] sm:$0xff]  ;;  %v238_v40 = vld [vmem:[%s1186_s30 + $0x80] sm:$0xff]  ;;  %v239_v41 = vld [vmem:[%s1186_s30 + $0x88] sm:$0xff]  ;;  %960 = vmatprep.subr.bf16.mxu1 %v1081_v59 }
  0x1f   : > { %v240_v42 = vld [vmem:[%s1186_s30 + $0x90] sm:$0xff]  ;;  %v241_v43 = vld [vmem:[%s1186_s30 + $0x98] sm:$0xff]  ;;  %v242_v44 = vld [vmem:[%s1186_s30 + $0xa0] sm:$0xff] }
  0x20   : > { %v243_v45 = vld [vmem:[%s1186_s30 + $0xa8] sm:$0xff]  ;;  %v244_v46 = vld [vmem:[%s1186_s30 + $0xb0] sm:$0xff]  ;;  %v245_v47 = vld [vmem:[%s1186_s30 + $0xb8] sm:$0xff] }
  0x21   : > { %938 = vmatpush3.bf16.msra.mxu0 %v935_v15  ;;  %v246_v48 = vld [vmem:[%s1186_s30 + $0xc0] sm:$0xff]  ;;  %v247_v49 = vld [vmem:[%s1186_s30 + $0xc8] sm:$0xff]  ;;  %v248_v50 = vld [vmem:[%s1186_s30 + $0xd0] sm:$0xff]  ;;  %962 = vmatpush3.bf16.msra.mxu1 %v961_v4 }
  0x22   : > { %940 = vmatprep.subr.bf16.mxu0 %v939_v18  ;;  %v249_v51 = vld [vmem:[%s1186_s30 + $0xd8] sm:$0xff]  ;;  %v250_v52 = vld [vmem:[%s1186_s30 + $0xe0] sm:$0xff]  ;;  %v251_v53 = vld [vmem:[%s1186_s30 + $0xe8] sm:$0xff]  ;;  %963 = vmatprep.subr.bf16.mxu1 %v1081_v59 }
  0x23   : > { %v252_v54 = vld [vmem:[%s1186_s30 + $0xf0] sm:$0xff]  ;;  %v253_v55 = vld [vmem:[%s1186_s30 + $0xf8] sm:$0xff]  ;;  %v584_v11 = vld [vmem:[%s1388_s3 + $0x60] sm:$0xff]  ;;  %s673_s30 = sshll.u32 %s216_s17, 4  ;;  %s1345_s30 = int_to_ptr.vmem [resolvable:$true] %s673_s30 }
  0x24   : > { %v582_v8 = vld [vmem:[%s1388_s3 + $0x50] sm:$0xff]  ;;  %v585_v12 = vld [vmem:[%s1388_s3 + $0x68] sm:$0xff]  ;;  %s1017_s7 = scalar_lea.vmem %s1345_s30, 16  ;;  %p1024_p0 = scmp.lt.s32.totalorder %s1345_s30, %s1022_s8 }
  0x25   : > { %942 = vmatpush3.bf16.msra.mxu0 %v939_v18  ;;  %965 = vmatpush3.bf16.msra.mxu1 %v964_v7  ;;  %v967_v10 = vpack.c.bf16 %v583_v9, %v582_v8  ;;  %v970_v13 = vpack.c.bf16 %v585_v12, %v584_v11  ;;  %v586_v15 = vld [vmem:[%s1388_s3 + $0x70] sm:$0xff]  ;;  %v1301_v18 = vld [vmem:[%s1387_s2] ss:$0 sm:$0xff]  ;;  %p1018_p11 = scmp.ne.s32.totalorder %s1345_s30, %s1017_s7  ;;  %p1025_p1 = scmp.lt.s32.totalorder %s1023_s9, %s1017_s7 }
  0x26   : > { %944 = vmatprep.subr.bf16.mxu0 %v943_v21  ;;  %966 = vmatprep.subr.bf16.mxu1 %v1081_v59  ;;  %v973_v17 = vpack.c.bf16 %v587_v16, %v586_v15 }
  0x27   : > { %p1019_p12 = pnand %p1018_p11, %p1153_p5  ;;  %p1026_p2 = por %p1025_p1, %p1024_p0 }
  0x29   : > { %946 = vmatpush3.bf16.msra.mxu0 %v943_v21  ;;  %968 = vmatpush3.bf16.msra.mxu1 %v967_v10  ;;  %p1020_p13 = pneg %p1019_p12 }
  0x2a   : > { %948 = vmatprep.subr.bf16.mxu0 %v947_v24  ;;  %969 = vmatprep.subr.bf16.mxu1 %v1081_v59 }
  0x2b   : > { %p1027_p3 = pnand %p1026_p2, %p1020_p13 }
  0x2d   : > { %950 = vmatpush3.bf16.msra.mxu0 %v947_v24  ;;  %971 = vmatpush3.bf16.msra.mxu1 %v970_v13 }
  0x2e   : > { %972 = vmatprep.subr.bf16.mxu1 %v1081_v59 }
  0x30   : > { %837 = vmatmul.mubr.f32.vlgmr.msra.gmra.mrb[0].mxu0 %v223_v25 }
  0x31   : > { %839 = vmatprep.mubr.f32.mxu0 %v224_v26  ;;  %974 = vmatpush3.bf16.msra.mxu1 %v973_v17 }
  0x34   : > { %840 = vmatmul.mubr.f32.gmra.mrb[2].mxu0 %v225_v27 }
  0x35   : > { %842 = vmatprep.mubr.f32.mxu0 %v226_v28 }
  0x38   : > { %843 = vmatmul.mubr.f32.gmra.mrb[4].mxu0 %v227_v29 }
  0x39   : > { %845 = vmatprep.mubr.f32.mxu0 %v228_v30 }
  0x3c   : > { %846 = vmatmul.mubr.f32.gmra.mrb[6].mxu0 %v229_v31 }
  0x3d   : > { %848 = vmatprep.mubr.f32.mxu0 %v230_v32 }
  0x40   : > { %849 = vmatmul.mubr.f32.gmra.mrb[8].mxu0 %v231_v33 }
  0x41   : > { %851 = vmatprep.mubr.f32.mxu0 %v232_v34 }
  0x44   : > { %852 = vmatmul.mubr.f32.gmra.mrb[10].mxu0 %v233_v35 }
  0x45   : > { %854 = vmatprep.mubr.f32.mxu0 %v234_v36 }
  0x48   : > { %855 = vmatmul.mubr.f32.gmra.mrb[12].mxu0 %v235_v37 }
  0x49   : > { %857 = vmatprep.mubr.f32.mxu0 %v236_v38 }
  0x4c   : > { %858 = vmatmul.mubr.f32.gmra.mrb[14].mxu0 %v237_v39 }
  0x4d   : > { %860 = vmatprep.mubr.f32.mxu0 %v238_v40 }
  0x50   : > { %861 = vmatmul.mubr.f32.gmra.mrb[16].mxu0 %v239_v41 }
  0x51   : > { %863 = vmatprep.mubr.f32.mxu0 %v240_v42 }
  0x54   : > { %864 = vmatmul.mubr.f32.gmra.mrb[18].mxu0 %v241_v43 }
  0x55   : > { %866 = vmatprep.mubr.f32.mxu0 %v242_v44 }
  0x58   : > { %867 = vmatmul.mubr.f32.gmra.mrb[20].mxu0 %v243_v45 }
  0x59   : > { %869 = vmatprep.mubr.f32.mxu0 %v244_v46 }
  0x5c   : > { %870 = vmatmul.mubr.f32.gmra.mrb[22].mxu0 %v245_v47 }
  0x5d   : > { %872 = vmatprep.mubr.f32.mxu0 %v246_v48 }
  0x60   : > { %873 = vmatmul.mubr.f32.gmra.mrb[24].mxu0 %v247_v49 }
  0x61   : > { %875 = vmatprep.mubr.f32.mxu0 %v248_v50 }
  0x64   : > { %876 = vmatmul.mubr.f32.gmra.mrb[26].mxu0 %v249_v51 }
  0x65   : > { %878 = vmatprep.mubr.f32.mxu0 %v250_v52 }
  0x68   : > { %879 = vmatmul.mubr.f32.gmra.mrb[28].mxu0 %v251_v53 }
  0x69   : > { %881 = vmatprep.mubr.f32.mxu0 %v252_v54 }
  0x6c   : > { %882 = vmatmul.mubr.f32.gmra.mrb[30].mxu0 %v253_v55 }
 0x103   : > { %v838_v19 = vpop.f32.mrb[0].mxu0 }
 0x104   : > { %v349_v20 = vadd.f32 %v838_v19, %v1301_v18  ;;  %v343_v21 = vpop.f32.mrb[1].mxu0 }
 0x105   : > { %v344_v22 = vadd.f32 %v1301_v18, %v343_v21 }
 0x106   : > { %v503_v23 = vmax.f32 %v349_v20, 0.0 }
 0x107   : > { %v502_v24 = vmax.f32 %v344_v22, 0.0  ;;  %v841_v25 = vpop.f32.mrb[2].mxu0 }
 0x108   : > { %v353_v26 = vpop.f32.mrb[3].mxu0  ;;  %v359_v28 = vadd.f32 %v841_v25, %v1301_v18 }
 0x109   : > { %v534_v27 = vadd.f32 %v503_v23, %v502_v24  ;;  %v354_v29 = vadd.f32 %v1301_v18, %v353_v26 }
 0x10a   : > { %v505_v33 = vmax.f32 %v359_v28, 0.0 }
 0x10b   : > { %v504_v30 = vmax.f32 %v354_v29, 0.0  ;;  %v844_v31 = vpop.f32.mrb[4].mxu0 }
 0x10c   : > { %v363_v32 = vpop.f32.mrb[5].mxu0  ;;  %v369_v35 = vadd.f32 %v844_v31, %v1301_v18 }
 0x10d   : > { %v535_v34 = vadd.f32 %v534_v27, %v504_v30  ;;  %v364_v36 = vadd.f32 %v1301_v18, %v363_v32 }
 0x10e   : > { %v507_v41 = vmax.f32 %v369_v35, 0.0 }
 0x10f   : > { %v506_v37 = vmax.f32 %v364_v36, 0.0  ;;  %v536_v38 = vadd.f32 %v535_v34, %v505_v33  ;;  %v847_v39 = vpop.f32.mrb[6].mxu0 }
 0x110   : > { %v373_v40 = vpop.f32.mrb[7].mxu0  ;;  %v379_v43 = vadd.f32 %v847_v39, %v1301_v18 }
 0x111   : > { %v537_v42 = vadd.f32 %v536_v38, %v506_v37  ;;  %v374_v44 = vadd.f32 %v1301_v18, %v373_v40 }
 0x112   : > { %v509_v49 = vmax.f32 %v379_v43, 0.0 }
 0x113   : > { %v508_v45 = vmax.f32 %v374_v44, 0.0  ;;  %v538_v46 = vadd.f32 %v537_v42, %v507_v41  ;;  %v850_v47 = vpop.f32.mrb[8].mxu0 }
 0x114   : > { %v383_v48 = vpop.f32.mrb[9].mxu0  ;;  %v389_v51 = vadd.f32 %v850_v47, %v1301_v18 }
 0x115   : > { %v539_v50 = vadd.f32 %v538_v46, %v508_v45  ;;  %v384_v52 = vadd.f32 %v1301_v18, %v383_v48 }
 0x116   : > { %v511_v57 = vmax.f32 %v389_v51, 0.0 }
 0x117   : > { %v510_v53 = vmax.f32 %v384_v52, 0.0  ;;  %v540_v54 = vadd.f32 %v539_v50, %v509_v49  ;;  %v853_v55 = vpop.f32.mrb[10].mxu0 }
 0x118   : > { %v393_v56 = vpop.f32.mrb[11].mxu0  ;;  %v399_v59 = vadd.f32 %v853_v55, %v1301_v18 }
 0x119   : > { %v541_v58 = vadd.f32 %v540_v54, %v510_v53  ;;  %v394_v60 = vadd.f32 %v1301_v18, %v393_v56 }
 0x11a   : > { %v513_v1 = vmax.f32 %v399_v59, 0.0 }
 0x11b   : > { %v512_v61 = vmax.f32 %v394_v60, 0.0  ;;  %v542_v62 = vadd.f32 %v541_v58, %v511_v57  ;;  %v856_v63 = vpop.f32.mrb[12].mxu0 }
 0x11c   : > { %v403_v0 = vpop.f32.mrb[13].mxu0  ;;  %v409_v3 = vadd.f32 %v856_v63, %v1301_v18 }
 0x11d   : > { %v543_v2 = vadd.f32 %v542_v62, %v512_v61  ;;  %v404_v4 = vadd.f32 %v1301_v18, %v403_v0 }
 0x11e   : > { %v515_v9 = vmax.f32 %v409_v3, 0.0 }
 0x11f   : > { %v514_v5 = vmax.f32 %v404_v4, 0.0  ;;  %v544_v6 = vadd.f32 %v543_v2, %v513_v1  ;;  %v859_v7 = vpop.f32.mrb[14].mxu0 }
 0x120   : > { %v413_v8 = vpop.f32.mrb[15].mxu0  ;;  %v419_v11 = vadd.f32 %v859_v7, %v1301_v18 }
 0x121   : > { %v545_v10 = vadd.f32 %v544_v6, %v514_v5  ;;  %v414_v12 = vadd.f32 %v1301_v18, %v413_v8 }
 0x122   : > { %v517_v17 = vmax.f32 %v419_v11, 0.0 }
 0x123   : > { %v516_v13 = vmax.f32 %v414_v12, 0.0  ;;  %v546_v14 = vadd.f32 %v545_v10, %v515_v9  ;;  %v862_v15 = vpop.f32.mrb[16].mxu0 }
 0x124   : > { %v423_v16 = vpop.f32.mrb[17].mxu0  ;;  %v429_v20 = vadd.f32 %v862_v15, %v1301_v18 }
 0x125   : > { %v547_v19 = vadd.f32 %v546_v14, %v516_v13  ;;  %v424_v21 = vadd.f32 %v1301_v18, %v423_v16 }
 0x126   : > { %v519_v26 = vmax.f32 %v429_v20, 0.0 }
 0x127   : > { %v518_v22 = vmax.f32 %v424_v21, 0.0  ;;  %v548_v23 = vadd.f32 %v547_v19, %v517_v17  ;;  %v865_v24 = vpop.f32.mrb[18].mxu0 }
 0x128   : > { %v433_v25 = vpop.f32.mrb[19].mxu0  ;;  %v439_v28 = vadd.f32 %v865_v24, %v1301_v18 }
 0x129   : > { %v549_v27 = vadd.f32 %v548_v23, %v518_v22  ;;  %v434_v29 = vadd.f32 %v1301_v18, %v433_v25 }
 0x12a   : > { %v521_v34 = vmax.f32 %v439_v28, 0.0 }
 0x12b   : > { %v520_v30 = vmax.f32 %v434_v29, 0.0  ;;  %v550_v31 = vadd.f32 %v549_v27, %v519_v26  ;;  %v868_v32 = vpop.f32.mrb[20].mxu0 }
 0x12c   : > { %v443_v33 = vpop.f32.mrb[21].mxu0  ;;  %v449_v36 = vadd.f32 %v868_v32, %v1301_v18 }
 0x12d   : > { %v551_v35 = vadd.f32 %v550_v31, %v520_v30  ;;  %v444_v37 = vadd.f32 %v1301_v18, %v443_v33 }
 0x12e   : > { %v523_v42 = vmax.f32 %v449_v36, 0.0 }
 0x12f   : > { %v522_v38 = vmax.f32 %v444_v37, 0.0  ;;  %v552_v39 = vadd.f32 %v551_v35, %v521_v34  ;;  %v871_v40 = vpop.f32.mrb[22].mxu0 }
 0x130   : > { %v453_v41 = vpop.f32.mrb[23].mxu0  ;;  %v459_v44 = vadd.f32 %v871_v40, %v1301_v18 }
 0x131   : > { %v553_v43 = vadd.f32 %v552_v39, %v522_v38  ;;  %v454_v45 = vadd.f32 %v1301_v18, %v453_v41 }
 0x132   : > { %v525_v50 = vmax.f32 %v459_v44, 0.0 }
 0x133   : > { %v524_v46 = vmax.f32 %v454_v45, 0.0  ;;  %v554_v47 = vadd.f32 %v553_v43, %v523_v42  ;;  %v874_v48 = vpop.f32.mrb[24].mxu0 }
 0x134   : > { %v463_v49 = vpop.f32.mrb[25].mxu0  ;;  %v469_v52 = vadd.f32 %v874_v48, %v1301_v18 }
 0x135   : > { %v555_v51 = vadd.f32 %v554_v47, %v524_v46  ;;  %v464_v53 = vadd.f32 %v1301_v18, %v463_v49 }
 0x136   : > { %v527_v58 = vmax.f32 %v469_v52, 0.0 }
 0x137   : > { %v526_v54 = vmax.f32 %v464_v53, 0.0  ;;  %v556_v55 = vadd.f32 %v555_v51, %v525_v50  ;;  %v877_v56 = vpop.f32.mrb[26].mxu0 }
 0x138   : > { %v473_v57 = vpop.f32.mrb[27].mxu0  ;;  %v479_v60 = vadd.f32 %v877_v56, %v1301_v18 }
 0x139   : > { %v557_v59 = vadd.f32 %v556_v55, %v526_v54  ;;  %v474_v61 = vadd.f32 %v1301_v18, %v473_v57 }
 0x13a   : > { %v529_v2 = vmax.f32 %v479_v60, 0.0 }
 0x13b   : > { %v528_v62 = vmax.f32 %v474_v61, 0.0  ;;  %v558_v63 = vadd.f32 %v557_v59, %v527_v58  ;;  %v880_v0 = vpop.f32.mrb[28].mxu0 }
 0x13c   : > { %v483_v1 = vpop.f32.mrb[29].mxu0  ;;  %v489_v4 = vadd.f32 %v880_v0, %v1301_v18 }
 0x13d   : > { %v559_v3 = vadd.f32 %v558_v63, %v528_v62  ;;  %v484_v5 = vadd.f32 %v1301_v18, %v483_v1 }
 0x13e   : > { %v531_v10 = vmax.f32 %v489_v4, 0.0 }
 0x13f   : > { %v530_v6 = vmax.f32 %v484_v5, 0.0  ;;  %v560_v7 = vadd.f32 %v559_v3, %v529_v2  ;;  %v883_v8 = vpop.f32.mrb[30].mxu0 }
 0x140   : > { %v493_v9 = vpop.f32.mrb[31].mxu0  ;;  %v499_v12 = vadd.f32 %v883_v8, %v1301_v18 }
 0x141   : > { %v561_v11 = vadd.f32 %v560_v7, %v530_v6  ;;  %v494_v13 = vadd.f32 %v1301_v18, %v493_v9  ;;  %v588_v18 = vld [vmem:[%s1389_s4] sm:$0x1] }
 0x142   : > { %v533_v16 = vmax.f32 %v499_v12, 0.0 }
 0x143   : > { %v532_v14 = vmax.f32 %v494_v13, 0.0  ;;  %v562_v15 = vadd.f32 %v561_v11, %v531_v10 }
 0x145   : > { %v563_v17 = vadd.f32 %v562_v15, %v532_v14 }
 0x147   : > { %v564_v19 = vadd.f32 %v563_v17, %v533_v16 }
 0x149   : > { %v565_v20 = vrot.slane %v564_v19, 4 }
 0x14b   : > { %v566_v21 = vadd.f32 %v565_v20, %v564_v19 }
 0x14d   : > { %v567_v22 = vrot.slane %v566_v21, 2 }
 0x14f   : > { %v568_v23 = vadd.f32 %v567_v22, %v566_v21 }
 0x151   : > { %v569_v24 = vrot.slane %v568_v23, 1 }
 0x153   : > { %v570_v25 = vadd.f32 %v569_v24, %v568_v23 }
 0x155   : > { %v571_v26 = vmul.f32 0.00390625, %v570_v25 }
 0x157   : > { %917 = vmatmul.mubr.f32.vlgmr.msra.gmra.mrb[0].mxu1 %v571_v26 }
 0x22a   : > { %v655_v27 = vpop.f32.mrb[0].mxu1 }
 0x22b   : > { %v656_v28 = vadd.f32 %v655_v27, %v588_v18  ;;  %v918_v29 = vpop.f32.mrb[1].mxu1 }
 0x22d   : > { %659 = vst [vmem:[%s216_s17] sm:$0x1] %v656_v28 }
 0x22e   : > { %1030 = shalt.err (!%p1027_p3)
}
 0x22f   : > { %s1031_s10 = scalar_lea.hbm %s1343_s26, 16  ;;  %s1035_s13 = scalar_lea.hbm %s1390_s5, 32 }
 0x230   : > { %p1032_p4 = scmp.ne.s32.totalorder %s1343_s26, %s1031_s10  ;;  %p1036_p9 = scmp.lt.u32.totalorder %s1343_s26, %s1390_s5 }
 0x231   : > { %p1037_p10 = scmp.lt.u32.totalorder %s1035_s13, %s1031_s10  ;;  %p1039_p12 = scmp.lt.u32.totalorder %s1031_s10, %s1343_s26 }
 0x232   : > { %p1033_p7 = pnand %p1032_p4, %p1153_p5 }
 0x233   : > { %p1038_p11 = por %p1037_p10, %p1036_p9 }
 0x234   : > { %p1034_p8 = pneg %p1033_p7 }
 0x235   : > { %p1040_p13 = por %p1039_p12, %p1038_p11 }
 0x237   : > { %p1041_p0 = pnand %p1040_p13, %p1034_p8 }
 0x239   : > { %1044 = shalt.err (!%p1041_p0)
}
 0x23a   : > { %975 = dma.vmem_to_hbm [thread:$0]  (%p1153_p5), %s1345_s30, 16, %s1343_s26, %s661_s6  }
 0x23b PF: > { %p981_p1 = scmp.ge.s32.totalorder %s1079_s21, 2  ;;  %s685_s16 = sand.u32 1, %s1067_s18  }
 0x23c   : > { %s686_s17 = scalar_lea.sflag [#allocation3], %s685_s16 }
 0x23d   : > { %p978_p2 = pnand %p981_p1, %p1157_p6 }
 0x23f   : > { %1062 = dma.done.wait (!%p978_p2), %s686_s17, 16  }
 0x240   : > { %1064 = vsyncadd (!%p978_p2), %s686_s17, 4294967280  ;;  %p15_p3 = scmp.ge.s32.totalorder %s1140_s24, 4   ;;  %s1393_s18 = smov %s1071_s19 }
 0x241   : > { %s1394_s19 = smov %s1075_s20  ;;  %s1395_s20 = smov %s1151_s27 }
 0x242   : > { %s1396_s21 = smov %s1140_s24  ;;  %17 = sbr.rel (!%p15_p3) target bundleno = 3 (0x3), region = 75 }
 0x249   :  { %690 = vsyncpa [#allocation3], 1 }
 0x24a   :  { %692 = vsyncpa [#allocation3 + $0x1], 1 }

</bundles_post_ra>
